<compile_context>
chip_gen: v5e
topology: v5e:2x2
jax: 0.10.0
libtpu: 0.0.40
codegen_flags: <defaults>
</compile_context>

<pallas_src>
import functools

import jax
import jax.numpy as jnp
from jax import lax
from jax.experimental import pallas as pl
from jax.experimental.pallas import tpu as pltpu

_LANE = 128     # vreg lane count (last-dim alignment)
_SUBLANE = 8    # f32 sublane count (second-to-last-dim alignment)


def _round_up(a, m):
    return (a + m - 1) // m * m


def _vmem_budget_bytes():
    """~75% of physical VMEM: ~96 MiB on v5e/v6e (128 MiB), ~48 MiB on v7x (64 MiB)."""
    try:
        cap = int(pltpu.get_tpu_info().vmem_capacity_bytes)
    except Exception:
        cap = 64 * 1024 * 1024  # conservative fallback (v7x per-core VMEM)
    return (cap * 3) // 4


def _fused_fits(c_pad, n_pad, budget):
    x_block = c_pad * n_pad * 4
    cc = c_pad * c_pad * 4
    # 2x input block (double-buffered) + 2x output block + f32 matmul temp
    # + energy/p/attn temporaries.
    return (5 * x_block + 4 * cc) <= budget


def _pick_n_tile(c_pad, n, budget):
    """Largest lane-aligned N tile that keeps both passes inside the VMEM budget."""
    cc = c_pad * c_pad * 4
    # pass 2: 2x attn block + 2x x block + 2x out block + f32 matmul temp
    cap2 = (budget - 4 * cc) // (5 * 4 * c_pad)
    # pass 1: 2x x block + 2x attn-out block + (C,C) scratch + softmax temps
    cap1 = (budget - 5 * cc) // (2 * 4 * c_pad)
    cap = min(cap1, cap2, 4096, _round_up(n, _LANE))
    return max(_LANE, (cap // _LANE) * _LANE)


def _masked_softmax_neg_energy(energy, c_real):
    """softmax(rowmax(E) - E) == exp(rowmin(E) - E) / sum  (shift-invariant),
    with zero-padded channel columns masked out of the normalization."""
    e_min = jnp.min(energy, axis=-1, keepdims=True)
    p = jnp.exp(e_min - energy)
    if c_real != energy.shape[-1]:  # only emit the mask when C was padded
        col = lax.broadcasted_iota(jnp.int32, energy.shape, 1)
        p = jnp.where(col < c_real, p, 0.0)
    return p / jnp.sum(p, axis=-1, keepdims=True)  # exact divide (runs once/batch)


# ---------------------------------------------------------------------------
# Fused single-pass kernel: grid=(B,), whole (C, N) slab resident in VMEM.
# ---------------------------------------------------------------------------
def _cam_fused_kernel(gamma_ref, x_ref, o_ref, *, c_real, bf16_mxu):
    x = x_ref[0]                                            # (C, N) f32
    lhs = x.astype(jnp.bfloat16) if bf16_mxu else x
    # energy = x @ x^T, contracting N on both operands (no materialized transpose).
    energy = lax.dot_general(
        lhs, lhs, dimension_numbers=(((1,), (1,)), ((), ())),
        preferred_element_type=jnp.float32)
    attn = _masked_softmax_neg_energy(energy, c_real)       # (C, C) f32
    if bf16_mxu:
        out = jnp.dot(attn.astype(jnp.bfloat16), lhs,
                      preferred_element_type=jnp.float32)
    else:
        out = jnp.dot(attn, x, preferred_element_type=jnp.float32)
    o_ref[0] = (gamma_ref[0] * out + x).astype(o_ref.dtype)


# ---------------------------------------------------------------------------
# Two-pass fallback (large slabs): pass 1 = Gram + softmax, pass 2 = attn @ x.
# ---------------------------------------------------------------------------
def _cam_attn_kernel(x_ref, attn_ref, energy_acc, *, c_real, bf16_mxu):
    nt = pl.program_id(1)

    @pl.when(nt == 0)
    def _():
        energy_acc[...] = jnp.zeros_like(energy_acc)

    x = x_ref[0]                                            # (C, TN)
    lhs = x.astype(jnp.bfloat16) if bf16_mxu else x
    energy_acc[...] += lax.dot_general(
        lhs, lhs, dimension_numbers=(((1,), (1,)), ((), ())),
        preferred_element_type=jnp.float32)

    @pl.when(nt == pl.num_programs(1) - 1)
    def _():
        attn = _masked_softmax_neg_energy(energy_acc[...], c_real)
        attn_ref[0] = attn.astype(attn_ref.dtype)


def _cam_out_kernel(gamma_ref, attn_ref, x_ref, o_ref, *, bf16_mxu):
    attn = attn_ref[0]                                      # (C, C), f32 or bf16
    x = x_ref[0]                                            # (C, TN) f32
    rhs = x.astype(jnp.bfloat16) if bf16_mxu else x
    out = jnp.dot(attn, rhs, preferred_element_type=jnp.float32)
    o_ref[0] = (gamma_ref[0] * out + x).astype(o_ref.dtype)


# ---------------------------------------------------------------------------
# Wrapper
# ---------------------------------------------------------------------------
def cam_module_forward(x, gamma, *, use_bf16_matmul=False, force_two_pass=False):
    """x: (B, C, H, W) float32, gamma: scalar. Returns gamma*(attn @ x) + x."""
    B, C, H, W = x.shape
    N = H * W
    dtype = x.dtype
    c_pad = max(_round_up(C, _SUBLANE), _SUBLANE)
    budget = _vmem_budget_bytes()
    gamma_arr = jnp.asarray(gamma, jnp.float32).reshape(1)

    def _pad(xf, n_pad):
        if c_pad != C or n_pad != N:
            xf = jnp.pad(xf, ((0, 0), (0, c_pad - C), (0, n_pad - N)))
        return xf

    x_flat = x.reshape(B, C, N)
    n_pad_full = max(_round_up(N, _LANE), _LANE)

    # ----- fused single-pass path: per-batch (C, N) slab fits in VMEM -------
    if (not force_two_pass) and _fused_fits(c_pad, n_pad_full, budget):
        xf = _pad(x_flat, n_pad_full)
        out = pl.pallas_call(
            functools.partial(_cam_fused_kernel, c_real=C, bf16_mxu=use_bf16_matmul),
            out_shape=jax.ShapeDtypeStruct((B, c_pad, n_pad_full), dtype),
            grid_spec=pltpu.PrefetchScalarGridSpec(
                num_scalar_prefetch=1,
                grid=(B,),
                in_specs=[pl.BlockSpec((1, c_pad, n_pad_full), lambda b, g: (b, 0, 0))],
                out_specs=pl.BlockSpec((1, c_pad, n_pad_full), lambda b, g: (b, 0, 0)),
            ),
            compiler_params=pltpu.CompilerParams(
                dimension_semantics=("parallel",),
                vmem_limit_bytes=budget,
            ),
        )(gamma_arr, xf)
        return out[:, :C, :N].reshape(B, C, H, W)

    # ----- two-pass fallback: N tiled, (C, C) Gram accumulated in VMEM ------
    tn = _pick_n_tile(c_pad, N, budget)
    n_pad = _round_up(N, tn)
    nt = n_pad // tn
    xf = _pad(x_flat, n_pad)
    attn_dtype = jnp.bfloat16 if use_bf16_matmul else jnp.float32

    attn = pl.pallas_call(
        functools.partial(_cam_attn_kernel, c_real=C, bf16_mxu=use_bf16_matmul),
        out_shape=jax.ShapeDtypeStruct((B, c_pad, c_pad), attn_dtype),
        grid_spec=pltpu.PrefetchScalarGridSpec(
            num_scalar_prefetch=0,
            grid=(B, nt),
            in_specs=[pl.BlockSpec((1, c_pad, tn), lambda b, n: (b, 0, n))],
            out_specs=pl.BlockSpec((1, c_pad, c_pad), lambda b, n: (b, 0, 0)),
            scratch_shapes=[pltpu.VMEM((c_pad, c_pad), jnp.float32)],
        ),
        compiler_params=pltpu.CompilerParams(
            dimension_semantics=("parallel", "arbitrary"),
            vmem_limit_bytes=budget,
        ),
    )(xf)

    out = pl.pallas_call(
        functools.partial(_cam_out_kernel, bf16_mxu=use_bf16_matmul),
        out_shape=jax.ShapeDtypeStruct((B, c_pad, n_pad), dtype),
        grid_spec=pltpu.PrefetchScalarGridSpec(
            num_scalar_prefetch=1,
            grid=(B, nt),
            in_specs=[
                # index_map is N-invariant -> attn is DMA'd once per batch; its
                # (double-buffered) footprint is accounted for in _pick_n_tile.
                pl.BlockSpec((1, c_pad, c_pad), lambda b, n, g: (b, 0, 0)),
                pl.BlockSpec((1, c_pad, tn), lambda b, n, g: (b, 0, n)),
            ],
            out_specs=pl.BlockSpec((1, c_pad, tn), lambda b, n, g: (b, 0, n)),
        ),
        compiler_params=pltpu.CompilerParams(
            dimension_semantics=("parallel", "parallel"),
            vmem_limit_bytes=budget,
        ),
    )(gamma_arr, attn, xf)
    return out[:, :C, :N].reshape(B, C, H, W)


# ---------------------------------------------------------------------------
# Pure-JAX reference mirroring the PyTorch forward.
# ---------------------------------------------------------------------------
def cam_module_ref(x, gamma, bf16_ops=False):
    B, C, H, W = x.shape
    q = x.reshape(B, C, -1)
    qm = q.astype(jnp.bfloat16) if bf16_ops else q
    prec = None if bf16_ops else jax.lax.Precision.HIGHEST
    energy = jnp.einsum('bcn,bdn->bcd', qm, qm,
                        preferred_element_type=jnp.float32, precision=prec)
    energy_new = jnp.max(energy, axis=-1, keepdims=True) - energy
    attention = jax.nn.softmax(energy_new, axis=-1)
    am = attention.astype(jnp.bfloat16) if bf16_ops else attention
    out = jnp.einsum('bcd,bdn->bcn', am, qm,
                     preferred_element_type=jnp.float32, precision=prec)
    return gamma * out.reshape(B, C, H, W) + x


if __name__ == "__main__":
    key = jax.random.PRNGKey(0)
    B, C, H, W = 2, 4, 16, 16
    x = jax.random.normal(key, (B, C, H, W), dtype=jnp.float32)

    # gamma is initialized to zero in the PyTorch module (Parameter(torch.zeros(1))).
    out0 = cam_module_forward(x, jnp.float32(0.0))
    jax.block_until_ready(out0)
    assert jnp.allclose(out0, cam_module_ref(x, jnp.float32(0.0)), atol=1e-5, rtol=1e-5)

    # Non-zero gamma exercises the fused path end-to-end (exact softmax divide).
    g = jnp.float32(0.5)
    out1 = cam_module_forward(x, g)
    jax.block_until_ready(out1)
    assert jnp.allclose(out1, cam_module_ref(x, g), atol=2e-3, rtol=2e-3)

    # Force the tiled two-pass fallback (large-slab path) on the same data.
    out2 = cam_module_forward(x, g, force_two_pass=True)
    jax.block_until_ready(out2)
    assert jnp.allclose(out2, cam_module_ref(x, g), atol=2e-3, rtol=2e-3)

    # Odd C / odd spatial size exercises the zero-padding + softmax-mask path.
    x_odd = jax.random.normal(jax.random.PRNGKey(1), (1, 6, 15, 15), dtype=jnp.float32)
    out3 = cam_module_forward(x_odd, g)
    jax.block_until_ready(out3)
    assert jnp.allclose(out3, cam_module_ref(x_odd, g), atol=2e-3, rtol=2e-3)

    # bf16 MXU-operand mode (v6e/v7x recommendation), checked against a matching
    # bf16-operand reference (the Gram of raw activations is range-sensitive, so
    # this mode is opt-in rather than the default).
    out4 = cam_module_forward(x, g, use_bf16_matmul=True)
    jax.block_until_ready(out4)
    assert jnp.allclose(out4, cam_module_ref(x, g, bf16_ops=True), atol=1e-2, rtol=1e-2)

    print("KERNEL_OK")
</pallas_src>

<mosaic_0001>
module attributes {stable_mosaic.version = 11 : i64} {
  func.func @_cam_fused_kernel(%arg0: i32, %arg1: memref<1xf32, #tpu.memory_space<smem>>, %arg2: memref<1x8x256xf32, #tpu.memory_space<vmem>>, %arg3: memref<1x8x256xf32, #tpu.memory_space<vmem>>) attributes {dimension_semantics = [#tpu.dimension_semantics<parallel>], iteration_bounds = array<i64: 2>, scalar_prefetch = 1 : i64, scratch_operands = 0 : i64, tpu.core_type = #tpu.core_type<tc>, window_params = [{transform_indices = @transform_0, window_bounds = array<i64: 1, 8, 256>}, {transform_indices = @transform_1, window_bounds = array<i64: 1, 8, 256>}]} {
    %c0 = arith.constant 0 : index
    %c0_0 = arith.constant 0 : index
    %c0_1 = arith.constant 0 : index
    %0 = vector.load %arg2[%c0, %c0_0, %c0_1] : memref<1x8x256xf32, #tpu.memory_space<vmem>>, vector<1x8x256xf32>
    %1 = vector.shape_cast %0 : vector<1x8x256xf32> to vector<8x256xf32>
    %cst = arith.constant dense<0.000000e+00> : vector<8x8xf32>
    %2 = tpu.matmul %1, %1, %cst {dimension_numbers = #tpu.dot_dimension_numbers<[1], [1], [0], [0], [0, 0, 1, 0], [], []>} : vector<8x256xf32>, vector<8x256xf32>, vector<8x8xf32> -> vector<8x8xf32>
    %cst_2 = arith.constant dense<0x7F800000> : vector<8xf32>
    %3 = vector.multi_reduction <minimumf>, %2, %cst_2 [1] : vector<8x8xf32> to vector<8xf32>
    %4 = vector.shape_cast %3 : vector<8xf32> to vector<8x1xf32>
    %5 = vector.broadcast %4 : vector<8x1xf32> to vector<8x8xf32>
    %6 = arith.subf %5, %2 : vector<8x8xf32>
    %7 = math.exp %6 : vector<8x8xf32>
    %8 = tpu.iota {dimensions = array<i32: 1>} : vector<8x8xi32>
    %c4_i32 = arith.constant 4 : i32
    %9 = vector.broadcast %c4_i32 : i32 to vector<8x8xi32>
    %10 = arith.cmpi slt, %8, %9 : vector<8x8xi32>
    %cst_3 = arith.constant 0.000000e+00 : f32
    %11 = vector.broadcast %cst_3 : f32 to vector<8x8xf32>
    %12 = arith.select %10, %7, %11 : vector<8x8xi1>, vector<8x8xf32>
    %cst_4 = arith.constant dense<0.000000e+00> : vector<8xf32>
    %13 = vector.multi_reduction <add>, %12, %cst_4 [1] : vector<8x8xf32> to vector<8xf32>
    %14 = vector.shape_cast %13 : vector<8xf32> to vector<8x1xf32>
    %15 = vector.broadcast %14 : vector<8x1xf32> to vector<8x8xf32>
    %16 = arith.divf %12, %15 : vector<8x8xf32>
    %cst_5 = arith.constant dense<0.000000e+00> : vector<8x256xf32>
    %17 = tpu.matmul %16, %1, %cst_5 {dimension_numbers = #tpu.dot_dimension_numbers<[1], [0], [0], [1], [0, 0, 1, 1], [], []>} : vector<8x8xf32>, vector<8x256xf32>, vector<8x256xf32> -> vector<8x256xf32>
    %c0_6 = arith.constant 0 : index
    %18 = memref.load %arg1[%c0_6] : memref<1xf32, #tpu.memory_space<smem>>
    %19 = vector.broadcast %18 : f32 to vector<8x256xf32>
    %20 = arith.mulf %19, %17 : vector<8x256xf32>
    %21 = arith.addf %20, %1 : vector<8x256xf32>
    %c0_7 = arith.constant 0 : index
    %c0_8 = arith.constant 0 : index
    %c0_9 = arith.constant 0 : index
    %22 = vector.load %arg3[%c0_7, %c0_8, %c0_9] : memref<1x8x256xf32, #tpu.memory_space<vmem>>, vector<1x8x256xf32>
    %23 = vector.shape_cast %22 : vector<1x8x256xf32> to vector<8x256xf32>
    %24 = vector.shape_cast %21 : vector<8x256xf32> to vector<1x8x256xf32>
    tpu.vector_store %arg3[%c0_7, %c0_8, %c0_9], %24 {strides = array<i32>} : memref<1x8x256xf32, #tpu.memory_space<vmem>>, vector<1x8x256xf32>,
    return
  }
  func.func @transform_0(%arg0: i32, %arg1: memref<1xf32, #tpu.memory_space<smem>>) -> (i32, i32, i32) {
    %c0_i32 = arith.constant 0 : i32
    %c0_i32_0 = arith.constant 0 : i32
    %c0_i32_1 = arith.constant 0 : i32
    return %arg0, %c0_i32, %c0_i32_0 : i32, i32, i32
  }
  func.func @transform_1(%arg0: i32, %arg1: memref<1xf32, #tpu.memory_space<smem>>) -> (i32, i32, i32) {
    %c0_i32 = arith.constant 0 : i32
    %c0_i32_0 = arith.constant 0 : i32
    %c0_i32_1 = arith.constant 0 : i32
    return %arg0, %c0_i32, %c0_i32_0 : i32, i32, i32
  }
}

</mosaic_0001>

<bundles_post_ra>
// kernel: tpu_custom_call.1
= control target key start
LH: loop header
LB: loop body
LE: loop exit
PB: predicated region body
PF: predicated region fallthrough
CT: control target
= control target key end

     0   :  { %s665_s0 = inlined_call_operand.<no memory space> [shape: f32[1], index: 0, kind: input, shape index: {}]   ;;  %s666_s1 = inlined_call_operand.hbm [shape: f32[2,8,256], index: 1, kind: input, shape index: {}]   ;;  %s667_s2 = inlined_call_operand.hbm [shape: f32[2,8,256], index: 2, kind: output, shape index: {}]  }
   0x1   :  { %7 = sst [smem:[#allocation3]] %s665_s0 }
   0x2   :  { %8 = vsyncpa [#allocation5], 0 }
   0x3   :  { %10 = vsyncpa [#allocation5 + $0x1], 0 }
   0x4   :  { %11 = vsyncpa [#allocation6], 0 }
   0x5   :  { %13 = vsyncpa [#allocation6 + $0x1], 0  ;;  %s530_s11 = smov 0   ;;  %s532_s12 = smov 0  }
   0x6   :  { %s534_s13 = smov 0   ;;  %s536_s14 = smov 0  }
   0x7 LB: > { %s551_s0 = sadd.s32 4294967295, %s510_s14   ;;  %s346_s15 = sadd.s32 4294967294, %s510_s14   ;;  %s510_s14 = sphi %s536_s14, %s677_s14   ;;  %s506_s13 = sphi %s534_s13, %s676_s13   ;;  %s502_s12 = sphi %s532_s12, %s675_s12   ;;  %s498_s11 = sphi %s530_s11, %s674_s11  }
   0x8   : > { %s555_s16 = sadd.s32 1, %s510_s14   ;;  %s26_s17 = sadd.s32 1, %s506_s13 }
   0x9   : > { %s23_s18 = ssub.s32 %s510_s14, %s555_s16  ;;  %p33_p0 = scmp.ne.s32.totalorder %s506_s13, %s502_s12 }
   0xa   : > { %p24_p1 = scmp.eq.s32.totalorder %s23_s18, 0  ;;  %p34_p2 = scmp.eq.s32.totalorder %s510_s14, 0 }
   0xb   : > { %p39_p3 = scmp.ne.s32.totalorder %s502_s12, %s498_s11  ;;  %p40_p4 = scmp.eq.s32.totalorder %s551_s0, 0 }
   0xc   : > { %s567_s19 = scalar_select %p24_p1, %s506_s13, %s26_s17  }
   0xd   : > { %p569_p5 = por %p34_p2, %p33_p0  ;;  %p573_p6 = por %p40_p4, %p39_p3 }
   0xe   : > { %p63_p7 = scmp.eq.s32.totalorder %s551_s0, 1  ;;  %p69_p8 = scmp.eq.s32.totalorder %s346_s15, 1 }
   0xf   : > { %p376_p10 = scmp.lt.s32.totalorder %s510_s14, 2  ;;  %s89_s24 = sand.u32 1, %s506_s13  }
  0x10   : > { %p580_p11 = por %p63_p7, %p33_p0  ;;  %p584_p12 = por %p69_p8, %p39_p3 }
  0x11   : > { %s362_s25 = sshll.u32 %s510_s14, 4  ;;  %s349_s26 = sshll.u32 %s89_s24, 4 }
  0x12   : > { %s98_s29 = scalar_lea.hbm %s666_s1, %s362_s25  ;;  %s93_s3 = scalar_lea.vmem [#allocation4], %s349_s26 }
  0x13   : > { %s100_s30 = sshll.u32 %s98_s29, 4  ;;  %s102_s4 = sshll.u32 %s93_s3, 4  ;;  %s101_s30 = int_to_ptr.hbm [resolvable:$true] %s100_s30  ;;  %s103_s4 = int_to_ptr.vmem [resolvable:$true] %s102_s4 }
  0x14   : > { %p595_p13 = pnand %p376_p10, %p569_p5  ;;  %p352_p0 = scmp.ge.s32.totalorder %s510_s14, 1 }
  0x15   : > { %p107_p1 = scmp.lt.s32.totalorder %s510_s14, 3  ;;  %s90_s6 = scalar_lea.sflag [#allocation5], %s89_s24 }
  0x16   : > { %s414_s7 = sshra.s32 %s101_s30, 4  ;;  %p418_p3 = pneg %p595_p13  ;;  %s415_s7 = int_to_ptr.hbm [resolvable:$true] %s414_s7 }
  0x17   : > { %s416_s8 = scalar_lea.hbm %s415_s7, 16  ;;  %s421_s15 = scalar_lea.hbm %s666_s1, 32 }
  0x18   : > { %p417_p2 = scmp.ne.s32.totalorder %s415_s7, %s416_s8  ;;  %p422_p5 = scmp.lt.s32.totalorder %s415_s7, %s666_s1 }
  0x19   : > { %p423_p8 = scmp.lt.s32.totalorder %s421_s15, %s416_s8 }
  0x1a   : > { %p419_p4 = pnand %p418_p3, %p417_p2 }
  0x1b   : > { %p424_p10 = por %p423_p8, %p422_p5 }
  0x1c   : > { %p420_p7 = pneg %p419_p4 }
  0x1e   : > { %p425_p9 = pnand %p424_p10, %p420_p7 }
  0x20   : > { %428 = shalt.err (!%p425_p9)
}
  0x21   : > { %371 = dma.hbm_to_vmem [thread:$0]  (!%p595_p13), %s101_s30, 256, %s103_s4, %s90_s6  }
  0x22   : > { %p108_p2 = pnand %p352_p0, %p107_p1 }
  0x23   : > { %s616_s20 = sand.u32 (!%p108_p2), 1, %s502_s12  }
  0x24   : > { %111 = sbr.rel (%p108_p2) target bundleno = 579 (0x243), region = 24  ;;  %s353_s24 = sshll.u32 (!%p108_p2), %s616_s20, 4 }
  0x25   : > { %s114_s25 = scalar_lea.sflag (!%p108_p2), [#allocation5], %s616_s20  ;;  %s117_s26 = scalar_lea.vmem (!%p108_p2), [#allocation4], %s353_s24 }
  0x29   : > { %489 = dma.done.wait (%p573_p6), %s114_s25, 256  }
  0x2a   : > { %491 = vsyncadd (%p573_p6), %s114_s25, 4294967040  ;;  %v137_v0 = vld [vmem:[%s117_s26] sm:$0xff]  ;;  %v138_v1 = vld [vmem:[%s117_s26 + $0x8] sm:$0xff]  ;;  %vm179_vm0 = vcmask 64512   ;;  %v186_v8 = vlaneseq  ;;  %s251_s21 = sld [smem:[#allocation3]]  ;;  %s363_s27 = sshll.u32 %s551_s0, 4 }
  0x2b   : > { %154 = vmatpush.xpose.msra.mxu0 %v137_v0  ;;  %174 = vmatpush.xpose.msra.mxu1 %v138_v1  ;;  %s271_s30 = scalar_lea.hbm %s667_s2, %s363_s27  ;;  %s136_s3 = scalar_lea.vmem [#allocation7], %s353_s24 }
  0x2c   : > { %226 = vmatpush.msra.mxu2 %v137_v0  ;;  %246 = vmatpush.msra.mxu3 %v138_v1  ;;  %v187_v10 = vand.u32 127, %v186_v8  ;;  %s273_s4 = sshll.u32 %s136_s3, 4  ;;  %s275_s5 = sshll.u32 %s271_s30, 4  ;;  %s274_s4 = int_to_ptr.vmem [resolvable:$true] %s273_s4  ;;  %s276_s5 = int_to_ptr.hbm [resolvable:$true] %s275_s5 }
  0x2d   : > { %s260_s0 = scalar_lea.sflag [#allocation6], %s616_s20  ;;  %s458_s6 = sshra.s32 %s276_s5, 4  ;;  %s459_s6 = int_to_ptr.hbm [resolvable:$true] %s458_s6 }
  0x2e   : > { %155 = vmatmul.f32.vlgmr.msra.gmra.mxu0 %v137_v0  ;;  %175 = vmatmul.f32.vlgmr.msra.gmra.mxu1 %v138_v1  ;;  %vm188_vm1 = vcmp.lt.s32.totalorder %v187_v10, 4  ;;  %s460_s7 = scalar_lea.hbm %s459_s6, 16  ;;  %s464_s10 = scalar_lea.hbm %s667_s2, 32 }
  0x2f   : > { %p461_p6 = scmp.ne.s32.totalorder %s459_s6, %s460_s7  ;;  %p465_p0 = scmp.lt.s32.totalorder %s459_s6, %s667_s2 }
  0x30   : > { %v252_v26 = vstv %s251_s21  ;;  %p466_p1 = scmp.lt.s32.totalorder %s464_s10, %s460_s7 }
  0x31   : > { %p462_p9 = pnand %p461_p6, %p580_p11 }
  0x32   : > { %p467_p3 = por %p466_p1, %p465_p0 }
  0x33   : > { %p463_p13 = pneg %p462_p9 }
  0x35   : > { %p468_p4 = pnand %p467_p3, %p463_p13 }
  0xab   : > { %v156_v2 = vpop.f32.mrf.mxu0  ;;  %v176_v3 = vpop.f32.mrf.mxu1 }
  0xac   : > { %v177_v4 = vadd.f32 %v176_v3, %v156_v2 }
  0xae   : > { %v180_v5 = vsel %vm179_vm0, %v177_v4, inf }
  0xaf   : > { %181 = vmin.xlane.f32.xlu0 %v180_v5 }
 0x122   : > { %v182_v6 = vpop.xlane.xlu0 %181 }
 0x123   : > { %v183_v7 = vsub.f32 %v182_v6, %v177_v4 }
 0x125   : > { %v184_v9 = vmul.f32 1.442695, %v183_v7 }
 0x127   : > { %410 = vpow2.f32 %v184_v9 }
 0x12d   : > { %v411_v11 = vpop.eup %410 }
 0x12e   : > { %v189_v12 = vsel %vm188_vm1, %v411_v11, 0.0 }
 0x12f   : > { %v190_v13 = vsel %vm179_vm0, %v189_v12, 0.0 }
 0x130   : > { %191 = vadd.xlane.f32.xlu0 %v190_v13 }
 0x1a3   : > { %v192_v14 = vpop.xlane.xlu0 %191 }
 0x1a4   : > { %412 = vrcp.f32 %v192_v14  ;;  %v204_v18 = vand.u32 2147483648, %v192_v14  ;;  %v202_v20 = vand.u32 2147483647, %v192_v14  ;;  %vm198_vm3 = vweird.f32 %v192_v14 }
 0x1a6   : > { %v205_v22 = vor.u32 1.1754944e-38, %v204_v18  ;;  %vm203_vm5 = vcmp.eq.f32.partialorder %v202_v20, 8.507059e+37 }
 0x1aa   : > { %v413_v15 = vpop.eup %412 }
 0x1ab   : > { %v194_v16 = vmul.f32 %v413_v15, %v192_v14  ;;  %vm199_vm2 = vweird.f32 %v413_v15 }
 0x1ac   : > { %vm200_vm4 = vmor %vm198_vm3, %vm199_vm2 }
 0x1ad   : > { %v195_v17 = vsub.f32 1.0, %v194_v16 }
 0x1af   : > { %v196_v19 = vmul.f32 %v413_v15, %v195_v17 }
 0x1b1   : > { %v197_v21 = vadd.f32 %v413_v15, %v196_v19 }
 0x1b3   : > { %v201_v23 = vsel %vm200_vm4, %v413_v15, %v197_v21 }
 0x1b4   : > { %v206_v24 = vsel %vm203_vm5, %v205_v22, %v201_v23 }
 0x1b5   : > { %v207_v25 = vmul.f32 %v206_v24, %v189_v12 }
 0x1b7   : > { %355 = vmatmul.msk.f32.vlgmr.msra.gmra.mxu2 %vm179_vm0, %v207_v25  ;;  %356 = vmatmul.msk.f32.vlgmr.msra.gmra.mxu3 %vm179_vm0, %v207_v25 }
 0x23a   : > { %v228_v27 = vpop.f32.mrf.mxu2  ;;  %v248_v28 = vpop.f32.mrf.mxu3 }
 0x23b   : > { %v253_v29 = vmul.f32 %v252_v26, %v228_v27  ;;  %v254_v30 = vmul.f32 %v252_v26, %v248_v28 }
 0x23d   : > { %v255_v31 = vadd.f32 %v253_v29, %v137_v0  ;;  %v256_v32 = vadd.f32 %v254_v30, %v138_v1 }
 0x23f   : > { %257 = vst [vmem:[%s136_s3] sm:$0xff] %v255_v31 }
 0x240   : > { %258 = vst [vmem:[%s136_s3 + $0x8] sm:$0xff] %v256_v32 }
 0x241   : > { %471 = shalt.err (!%p468_p4)
}
 0x242   : > { %366 = dma.vmem_to_hbm [thread:$0]  (%p580_p11), %s274_s4, 256, %s276_s5, %s260_s0  }
 0x243 PF: > { %s287_s18 = sand.u32 1, %s498_s11   ;;  %p673_p7 = scmp.ge.s32.totalorder %s510_s14, 2 }
 0x244   : > { %s288_s20 = scalar_lea.sflag [#allocation6], %s287_s18 }
 0x245   : > { %p373_p5 = pnand %p673_p7, %p584_p12 }
 0x247   : > { %p374_p8 = pneg %p373_p5 }
 0x249   : > { %493 = dma.done.wait (%p374_p8), %s288_s20, 256  }
 0x24a   : > { %495 = vsyncadd (%p374_p8), %s288_s20, 4294967040  ;;  %p16_p10 = scmp.ge.s32.totalorder %s555_s16, 4   ;;  %s674_s11 = smov %s502_s12 }
 0x24b   : > { %s675_s12 = smov %s506_s13  ;;  %s676_s13 = smov %s567_s19 }
 0x24c   : > { %s677_s14 = smov %s555_s16  ;;  %18 = sbr.rel (!%p16_p10) target bundleno = 7 (0x7), region = 69 }
 0x251   :  { %294 = vsyncpa [#allocation5], 1 }
 0x252   :  { %296 = vsyncpa [#allocation5 + $0x1], 1 }
 0x253   :  { %297 = vsyncpa [#allocation6], 1 }
 0x254   :  { %299 = vsyncpa [#allocation6 + $0x1], 1 }

</bundles_post_ra>
